<compile_context>
chip_gen: v7x
topology: tpu7x:2x2x1
jax: 0.10.0
libtpu: 0.0.40
codegen_flags: <defaults>
</compile_context>

<pallas_src>
import jax
import jax.numpy as jnp
from jax.experimental import pallas as pl
from jax.experimental.pallas import tpu as pltpu


def _conv1x1_kernel(x_ref, w_ref, b_ref, o_ref):
    # x_ref: (C_in, TL), w_ref: (C_out, C_in), b_ref: (C_out, 1), o_ref: (C_out, TL)
    c_in = x_ref.shape[0]
    c_out, tl = o_ref.shape

    # Start from the lane-broadcast bias (f32 accumulator).
    acc = jnp.broadcast_to(b_ref[...].astype(jnp.float32), (c_out, tl))

    if c_in <= 8:
        # VPU path: a few broadcast-multiply-adds over the lane-dense spatial
        # tile; keeps the kernel purely HBM-bandwidth limited.
        w = w_ref[...].astype(jnp.float32)          # (C_out, C_in), loaded once
        for k in range(c_in):
            acc = acc + w[:, k:k + 1] * x_ref[k:k + 1, :].astype(jnp.float32)
    else:
        # MXU path for larger channel counts: (C_out, C_in) @ (C_in, TL).
        acc = acc + jnp.dot(w_ref[...], x_ref[...],
                            preferred_element_type=jnp.float32)

    o_ref[...] = acc.astype(o_ref.dtype)


def conv1x1_pallas(x_nchw, weight, bias, *, vmem_tile_budget_bytes=4 << 20):
    """1x1 Conv2d with bias, equivalent to torch.nn.Conv2d(c_in, c_out, (1,1)).

    x_nchw : (N, C_in, H, W)
    weight : (C_out, C_in) or (C_out, C_in, 1, 1) (torch layout accepted)
    bias   : (C_out,)
    returns: (N, C_out, H, W)
    """
    if weight.ndim == 4:                       # torch Conv2d weight layout
        weight = weight.reshape(weight.shape[0], weight.shape[1])

    N, C_in, H, W = x_nchw.shape
    C_out = weight.shape[0]
    L = H * W
    dt = x_nchw.dtype
    itemsize = jnp.dtype(dt).itemsize

    LANE = 128

    def round_up(a, b):
        return (a + b - 1) // b * b

    # Largest spatial tile whose double-buffered input+output blocks stay
    # within a conservative VMEM budget (safe on v7x's 64 MiB VMEM as well).
    tl_max = vmem_tile_budget_bytes // (2 * (C_in + C_out) * itemsize)
    tl_max = max(LANE, (tl_max // LANE) * LANE)
    tl = min(tl_max, round_up(L, LANE))
    L_pad = round_up(L, tl)
    num_tiles = L_pad // tl
    # Keep at least 2 grid steps so both TensorCores get work on v7x.
    if N * num_tiles < 2 and L_pad % (2 * LANE) == 0:
        tl = L_pad // 2
        num_tiles = 2

    # NCHW -> (N, C_in, H*W): contiguous reshape, no transpose / extra HBM pass.
    x3 = x_nchw.reshape(N, C_in, L)
    if L_pad != L:
        x3 = jnp.pad(x3, ((0, 0), (0, 0), (0, L_pad - L)))

    # TODO(synk): very large C_in/C_out would need a channel-tiled grid axis;
    # here the full (C_out, C_in) weight stays resident in VMEM.
    w2d = weight                   # (C_out, C_in)
    b2d = bias.reshape(C_out, 1)   # (C_out, 1) -> lane-broadcast in-kernel

    out3 = pl.pallas_call(
        _conv1x1_kernel,
        out_shape=jax.ShapeDtypeStruct((N, C_out, L_pad), dt),
        grid_spec=pltpu.PrefetchScalarGridSpec(
            num_scalar_prefetch=0,
            grid=(N, num_tiles),
            in_specs=[
                pl.BlockSpec((None, C_in, tl), lambda n, j: (n, 0, j)),
                pl.BlockSpec((C_out, C_in), lambda n, j: (0, 0)),
                pl.BlockSpec((C_out, 1), lambda n, j: (0, 0)),
            ],
            out_specs=pl.BlockSpec((None, C_out, tl), lambda n, j: (n, 0, j)),
        ),
        compiler_params=pltpu.CompilerParams(
            dimension_semantics=("parallel", "parallel"),
            vmem_limit_bytes=32 * 1024 * 1024,
        ),
    )(x3, w2d, b2d)

    if L_pad != L:
        out3 = out3[:, :, :L]
    return out3.reshape(N, C_out, H, W)


if __name__ == "__main__":
    key = jax.random.PRNGKey(0)
    kx, kw, kb = jax.random.split(key, 3)

    N, C_in, C_out, H, W = 2, 4, 8, 16, 16

    x = jax.random.normal(kx, (N, C_in, H, W), dtype=jnp.float32)
    # Deterministic parameter init (matches Conv2d(c_in, c_out, (1,1)) shapes).
    fan_in = C_in  # kernel is 1x1
    bound = 1.0 / jnp.sqrt(fan_in)
    weight = jax.random.uniform(kw, (C_out, C_in), minval=-bound, maxval=bound,
                                dtype=jnp.float32)
    bias = jax.random.uniform(kb, (C_out,), minval=-bound, maxval=bound,
                              dtype=jnp.float32)

    out = conv1x1_pallas(x, weight, bias)
    out = jax.block_until_ready(out)

    # Pure-JAX reference (1x1 conv == einsum over channel dim + bias).
    ref = jnp.einsum("nchw,oc->nohw", x, weight) + bias[None, :, None, None]
    assert out.shape == (N, C_out, H, W)
    assert jnp.allclose(out, ref, atol=1e-5, rtol=1e-5)

    print("KERNEL_OK")
</pallas_src>

<mosaic_0001>
module attributes {stable_mosaic.version = 11 : i64} {
  func.func @_conv1x1_kernel(%arg0: i32, %arg1: i32, %arg2: memref<1x4x256xf32, #tpu.memory_space<vmem>>, %arg3: memref<8x4xf32, #tpu.memory_space<vmem>>, %arg4: memref<8x1xf32, #tpu.memory_space<vmem>>, %arg5: memref<1x8x256xf32, #tpu.memory_space<vmem>>) attributes {dimension_semantics = [#tpu.dimension_semantics<parallel>, #tpu.dimension_semantics<parallel>], iteration_bounds = array<i64: 2, 1>, scalar_prefetch = 0 : i64, scratch_operands = 0 : i64, tpu.core_type = #tpu.core_type<tc>, window_params = [{transform_indices = @transform_0, window_bounds = array<i64: 1, 4, 256>}, {pipeline_mode = #tpu.pipeline_mode<synchronous>, transform_indices = @transform_1, window_bounds = array<i64: 8, 4>}, {pipeline_mode = #tpu.pipeline_mode<synchronous>, transform_indices = @transform_2, window_bounds = array<i64: 8, 1>}, {transform_indices = @transform_3, window_bounds = array<i64: 1, 8, 256>}]} {
    %c0 = arith.constant 0 : index
    %c0_0 = arith.constant 0 : index
    %0 = vector.load %arg4[%c0, %c0_0] : memref<8x1xf32, #tpu.memory_space<vmem>>, vector<8x1xf32>
    %1 = vector.shape_cast %0 : vector<8x1xf32> to vector<8x1xf32>
    %2 = vector.broadcast %1 : vector<8x1xf32> to vector<8x256xf32>
    %c0_1 = arith.constant 0 : index
    %c0_2 = arith.constant 0 : index
    %3 = vector.load %arg3[%c0_1, %c0_2] : memref<8x4xf32, #tpu.memory_space<vmem>>, vector<8x4xf32>
    %4 = vector.extract_strided_slice %3 {offsets = [0, 0], sizes = [8, 1], strides = [1, 1]} : vector<8x4xf32> to vector<8x1xf32>
    %c0_3 = arith.constant 0 : index
    %c0_4 = arith.constant 0 : index
    %c0_5 = arith.constant 0 : index
    %5 = vector.load %arg2[%c0_3, %c0_4, %c0_5] : memref<1x4x256xf32, #tpu.memory_space<vmem>>, vector<1x1x256xf32>
    %6 = vector.shape_cast %5 : vector<1x1x256xf32> to vector<1x256xf32>
    %7 = vector.broadcast %4 : vector<8x1xf32> to vector<8x256xf32>
    %8 = vector.broadcast %6 : vector<1x256xf32> to vector<8x256xf32>
    %9 = arith.mulf %7, %8 : vector<8x256xf32>
    %10 = arith.addf %2, %9 : vector<8x256xf32>
    %11 = vector.extract_strided_slice %3 {offsets = [0, 1], sizes = [8, 1], strides = [1, 1]} : vector<8x4xf32> to vector<8x1xf32>
    %c0_6 = arith.constant 0 : index
    %c1 = arith.constant 1 : index
    %c0_7 = arith.constant 0 : index
    %12 = vector.load %arg2[%c0_6, %c1, %c0_7] : memref<1x4x256xf32, #tpu.memory_space<vmem>>, vector<1x1x256xf32>
    %13 = vector.shape_cast %12 : vector<1x1x256xf32> to vector<1x256xf32>
    %14 = vector.broadcast %11 : vector<8x1xf32> to vector<8x256xf32>
    %15 = vector.broadcast %13 : vector<1x256xf32> to vector<8x256xf32>
    %16 = arith.mulf %14, %15 : vector<8x256xf32>
    %17 = arith.addf %10, %16 : vector<8x256xf32>
    %18 = vector.extract_strided_slice %3 {offsets = [0, 2], sizes = [8, 1], strides = [1, 1]} : vector<8x4xf32> to vector<8x1xf32>
    %c0_8 = arith.constant 0 : index
    %c2 = arith.constant 2 : index
    %c0_9 = arith.constant 0 : index
    %19 = vector.load %arg2[%c0_8, %c2, %c0_9] : memref<1x4x256xf32, #tpu.memory_space<vmem>>, vector<1x1x256xf32>
    %20 = vector.shape_cast %19 : vector<1x1x256xf32> to vector<1x256xf32>
    %21 = vector.broadcast %18 : vector<8x1xf32> to vector<8x256xf32>
    %22 = vector.broadcast %20 : vector<1x256xf32> to vector<8x256xf32>
    %23 = arith.mulf %21, %22 : vector<8x256xf32>
    %24 = arith.addf %17, %23 : vector<8x256xf32>
    %25 = vector.extract_strided_slice %3 {offsets = [0, 3], sizes = [8, 1], strides = [1, 1]} : vector<8x4xf32> to vector<8x1xf32>
    %c0_10 = arith.constant 0 : index
    %c3 = arith.constant 3 : index
    %c0_11 = arith.constant 0 : index
    %26 = vector.load %arg2[%c0_10, %c3, %c0_11] : memref<1x4x256xf32, #tpu.memory_space<vmem>>, vector<1x1x256xf32>
    %27 = vector.shape_cast %26 : vector<1x1x256xf32> to vector<1x256xf32>
    %28 = vector.broadcast %25 : vector<8x1xf32> to vector<8x256xf32>
    %29 = vector.broadcast %27 : vector<1x256xf32> to vector<8x256xf32>
    %30 = arith.mulf %28, %29 : vector<8x256xf32>
    %31 = arith.addf %24, %30 : vector<8x256xf32>
    %c0_12 = arith.constant 0 : index
    %c0_13 = arith.constant 0 : index
    %c0_14 = arith.constant 0 : index
    %32 = vector.load %arg5[%c0_12, %c0_13, %c0_14] : memref<1x8x256xf32, #tpu.memory_space<vmem>>, vector<1x8x256xf32>
    %33 = vector.shape_cast %32 : vector<1x8x256xf32> to vector<8x256xf32>
    %34 = vector.shape_cast %31 : vector<8x256xf32> to vector<1x8x256xf32>
    tpu.vector_store %arg5[%c0_12, %c0_13, %c0_14], %34 {strides = array<i32>} : memref<1x8x256xf32, #tpu.memory_space<vmem>>, vector<1x8x256xf32>,
    return
  }
  func.func @transform_0(%arg0: i32, %arg1: i32) -> (i32, i32, i32) {
    %c0_i32 = arith.constant 0 : i32
    %c0_i32_0 = arith.constant 0 : i32
    return %arg0, %c0_i32, %arg1 : i32, i32, i32
  }
  func.func @transform_1(%arg0: i32, %arg1: i32) -> (i32, i32) {
    %c0_i32 = arith.constant 0 : i32
    %c0_i32_0 = arith.constant 0 : i32
    %c0_i32_1 = arith.constant 0 : i32
    return %c0_i32, %c0_i32_0 : i32, i32
  }
  func.func @transform_2(%arg0: i32, %arg1: i32) -> (i32, i32) {
    %c0_i32 = arith.constant 0 : i32
    %c0_i32_0 = arith.constant 0 : i32
    %c0_i32_1 = arith.constant 0 : i32
    return %c0_i32, %c0_i32_0 : i32, i32
  }
  func.func @transform_3(%arg0: i32, %arg1: i32) -> (i32, i32, i32) {
    %c0_i32 = arith.constant 0 : i32
    %c0_i32_0 = arith.constant 0 : i32
    return %arg0, %c0_i32, %arg1 : i32, i32, i32
  }
}

</mosaic_0001>

<bundles_post_ra>
// kernel: tpu_custom_call.1
= control target key start
LH: loop header
LB: loop body
LE: loop exit
PB: predicated region body
PF: predicated region fallthrough
CT: control target
= control target key end

     0   :  { %8 = vsyncpa [#allocation3], 0  ;;  %s694_s0 = inlined_call_operand.vmem [shape: f32[2,4,256], index: 0, kind: input, shape index: {}]   ;;  %s695_s1 = inlined_call_operand.vmem [shape: f32[8,4], index: 1, kind: input, shape index: {}]   ;;  %s696_s2 = inlined_call_operand.vmem [shape: f32[8,1], index: 2, kind: input, shape index: {}]   ;;  %s697_s3 = inlined_call_operand.hbm [shape: f32[2,8,256], index: 3, kind: output, shape index: {}]  }
   0x1   :  { %10 = vsyncpa [#allocation3 + $0x1], 0  ;;  %s572_s12 = smov 0   ;;  %s574_s13 = smov 0  }
   0x2   :  { %s576_s14 = smov 0   ;;  %s578_s15 = smov 0  }
   0x3   :  { %s580_s16 = smov 0   ;;  %s582_s17 = smov 0  }
   0x4 LB: > { %s386_s18 = sadd.s32 4294967295, %s545_s17   ;;  %s387_s19 = sadd.s32 4294967294, %s545_s17   ;;  %s545_s17 = sphi %s582_s17, %s16_s17   ;;  %s541_s16 = sphi %s580_s16, %s704_s16   ;;  %s537_s15 = sphi %s578_s15, %s703_s15   ;;  %s533_s14 = sphi %s576_s14, %s702_s14   ;;  %s529_s13 = sphi %s574_s13, %s701_s13   ;;  %s525_s12 = sphi %s572_s12, %s700_s12  }
   0x5   : > { %s28_s20 = sadd.s32 1, %s541_s16  ;;  %s107_s21 = sadd.s32 1, %s533_s14 }
   0x6   : > { %p30_p0 = scmp.ge.s32.totalorder %s28_s20, 2  ;;  %p117_p1 = scmp.ne.s32.totalorder %s533_s14, %s529_s13 }
   0x7   : > { %p118_p2 = scmp.eq.s32.totalorder %s386_s18, 1  ;;  %p123_p3 = scmp.ne.s32.totalorder %s529_s13, %s525_s12 }
   0x8   : > { %s706_s20 = smov (%p30_p0, %s28_s20), 0  ;;  %p124_p5 = scmp.eq.s32.totalorder %s387_s19, 1 }
   0x9   : > { %p612_p4 = por %p118_p2, %p117_p1  ;;  %s102_s23 = ssub.s32 %s541_s16, %s706_s20 }
   0xa   : > { %p390_p6 = scmp.ge.s32.totalorder %s545_s17, 1  ;;  %p105_p7 = scmp.eq.s32.totalorder %s102_s23, 0 }
   0xb   : > { %p619_p8 = por %p124_p5, %p123_p3  ;;  %p161_p9 = scmp.lt.s32.totalorder %s545_s17, 3 }
   0xc   : > { %s625_s25 = scalar_select %p105_p7, %s533_s14, %s107_s21  }
   0xd   : > { %p162_p10 = pnand %p390_p6, %p161_p9 }
   0xe   : > { %v206_v0 = vld [vmem:[%s695_s1] sm:$0xff] (!%p162_p10)  ;;  %v547_v1 = vmov (!%p162_p10), 0   ;;  %v548_v2 = vmov (!%p162_p10), 1   ;;  %v549_v4 = vmov (!%p162_p10), 2   ;;  %v550_v5 = vmov (!%p162_p10), 3   ;;  %p190_p11 = scmp.lt.s32.totalorder (!%p162_p10), %s537_s15, 1 }
   0xf   : > { %165 = sbr.rel (%p162_p10) target bundleno = 171 (0xab), region = 32  ;;  %463 = vset.pattern.permute.xlu0 (!%p162_p10), %v547_v1  ;;  %464 = vset.pattern.permute.xlu1 (!%p162_p10), %v548_v2  ;;  %v200_v3 = vld [vmem:[%s696_s2] sm:$0xff] (!%p162_p10)  ;;  %v214_v6 = vlaneseq (!%p162_p10)  ;;  %s186_s8 = sand.u32 (!%p162_p10), 1, %s529_s13  }
  0x10   : > { %210 = vperm.xlu0 (!%p162_p10), %463, %v206_v0   ;;  %231 = vperm.xlu1 (!%p162_p10), %464, %v206_v0   ;;  %s391_s9 = sshll.u32 (!%p162_p10), %s186_s8, 4  ;;  %s403_s10 = sshll.u32 (!%p162_p10), %s537_s15, 8 }
  0x11   : > { %v215_v7 = vshrl.u32 (!%p162_p10), %v214_v6, 7  ;;  %s188_s11 = scalar_lea.vmem (!%p162_p10), [#allocation2], %s391_s9  ;;  %s645_s23 = scalar_lea.hbm (!%p162_p10), %s697_s3, %s403_s10 }
  0x12   : > { %s310_s18 = sshll.u32 (!%p162_p10), %s188_s11, 4  ;;  %s551_s27 = smov (!%p162_p10), [#allocation2]   ;;  %s647_s18 = int_to_ptr.vmem [resolvable:$true] %s310_s18 }
  0x13   : > { %v216_v8 = vsub.s32 (!%p162_p10), 0, %v215_v7  ;;  %v220_v9 = vsub.s32 (!%p162_p10), 1, %v215_v7  ;;  %s467_s26 = scalar_lea.vmem (!%p162_p10), %s647_s18, 256  ;;  %s471_s28 = sshll.u32 (!%p162_p10), %s551_s27, 4  ;;  %s472_s28 = int_to_ptr.vmem [resolvable:$false] %s471_s28 }
  0x14   : > { %203 = vperm.xlu0 (!%p162_p10), %463, %v200_v3   ;;  %465 = vset.pattern.permute.xlu1 (!%p162_p10), %v549_v4  ;;  %p468_p12 = scmp.ne.s32.totalorder (!%p162_p10), %s647_s18, %s467_s26  ;;  %s473_s29 = scalar_lea.vmem (!%p162_p10), %s472_s28, 512 }
  0x15   : > { %252 = vperm.xlu1 (!%p162_p10), %465, %v206_v0   ;;  %p474_p1 = scmp.lt.s32.totalorder (!%p162_p10), %s647_s18, %s472_s28  ;;  %p475_p2 = scmp.lt.s32.totalorder (!%p162_p10), %s473_s29, %s467_s26 }
  0x16   : > { %s191_s30 = scalar_select %p190_p11, %s537_s15, 1 }
  0x17   : > { %s294_s15 = scalar_lea.sflag [#allocation3], %s186_s8  ;;  %p469_p13 = pnand %p468_p12, %p612_p4 }
  0x18   : > { %466 = vset.pattern.permute.xlu0 %v550_v5  ;;  %s402_s4 = sshll.u32 %s191_s30, 3  ;;  %p476_p3 = por %p475_p2, %p474_p1 }
  0x19   : > { %273 = vperm.xlu0 %466, %v206_v0   ;;  %s197_s7 = scalar_lea.vmem %s694_s0, %s402_s4  ;;  %p470_p0 = pneg %p469_p13 }
  0x1a   : > { %v207_v10 = vld [vmem:[%s197_s7] ss:$4 sm:$0x3]  ;;  %v394_v11 = vld [vmem:[%s197_s7 + $0x1] ss:$4 sm:$0x3] }
  0x1b   : > { %v217_v12 = vrot.slane %v207_v10, %v216_v8  ;;  %v221_v13 = vrot.slane %v207_v10, %v220_v9  ;;  %v395_v14 = vld [vmem:[%s197_s7 + $0x2] ss:$4 sm:$0x3]  ;;  %v238_v17 = vrot.slane %v394_v11, %v216_v8  ;;  %v242_v18 = vrot.slane %v394_v11, %v220_v9  ;;  %v396_v23 = vld [vmem:[%s197_s7 + $0x3] ss:$4 sm:$0x3]  ;;  %p477_p5 = pnand %p476_p3, %p470_p0 }
  0x1c   : > { %v259_v19 = vrot.slane %v395_v14, %v216_v8  ;;  %v263_v20 = vrot.slane %v395_v14, %v220_v9  ;;  %v280_v32 = vrot.slane %v396_v23, %v216_v8  ;;  %v284_v33 = vrot.slane %v396_v23, %v220_v9 }
  0x8f   : > { %v211_v15 = vpop.permute.xlu0 %210  ;;  %v232_v16 = vpop.permute.xlu1 %231 }
  0x90   : > { %v224_v21 = vmul.f32 %v217_v12, %v211_v15  ;;  %v225_v22 = vmul.f32 %v221_v13, %v211_v15  ;;  %v245_v25 = vmul.f32 %v238_v17, %v232_v16  ;;  %v246_v26 = vmul.f32 %v242_v18, %v232_v16 }
  0x93   : > { %v204_v24 = vpop.permute.xlu0 %203 }
  0x94   : > { %v226_v27 = vadd.f32 %v224_v21, %v204_v24  ;;  %v227_v28 = vadd.f32 %v225_v22, %v204_v24  ;;  %v253_v29 = vpop.permute.xlu1 %252 }
  0x95   : > { %v266_v30 = vmul.f32 %v259_v19, %v253_v29  ;;  %v267_v31 = vmul.f32 %v263_v20, %v253_v29 }
  0x96   : > { %v247_v34 = vadd.f32 %v245_v25, %v226_v27  ;;  %v248_v35 = vadd.f32 %v246_v26, %v227_v28 }
  0x98   : > { %v268_v36 = vadd.f32 %v266_v30, %v247_v34  ;;  %v269_v37 = vadd.f32 %v267_v31, %v248_v35  ;;  %v274_v38 = vpop.permute.xlu0 %273 }
  0x99   : > { %v287_v39 = vmul.f32 %v280_v32, %v274_v38  ;;  %v288_v40 = vmul.f32 %v284_v33, %v274_v38 }
  0x9b   : > { %v289_v41 = vadd.f32 %v287_v39, %v268_v36  ;;  %v290_v42 = vadd.f32 %v288_v40, %v269_v37 }
  0x9d   : > { %291 = vst [vmem:[%s188_s11] sm:$0xff] %v289_v41  ;;  %292 = vst [vmem:[%s188_s11 + $0x8] sm:$0xff] %v290_v42 }
  0x9e   : > { %480 = shalt.err (!%p477_p5)
}
  0x9f   : > { %s481_s30 = scalar_lea.hbm %s645_s23, 256  ;;  %s485_s6 = scalar_lea.hbm %s697_s3, 512 }
  0xa0   : > { %p482_p6 = scmp.ne.s32.totalorder %s645_s23, %s481_s30  ;;  %p486_p10 = scmp.lt.u32.totalorder %s645_s23, %s697_s3 }
  0xa1   : > { %p487_p11 = scmp.lt.u32.totalorder %s485_s6, %s481_s30  ;;  %p489_p13 = scmp.lt.u32.totalorder %s481_s30, %s645_s23 }
  0xa2   : > { %p483_p7 = pnand %p482_p6, %p612_p4 }
  0xa3   : > { %p488_p12 = por %p487_p11, %p486_p10 }
  0xa4   : > { %p484_p9 = pneg %p483_p7 }
  0xa5   : > { %p490_p0 = por %p489_p13, %p488_p12 }
  0xa7   : > { %p491_p1 = pnand %p490_p0, %p484_p9 }
  0xa9   : > { %494 = shalt.err (!%p491_p1)
}
  0xaa   : > { %404 = dma.vmem_to_hbm [thread:$0]  (%p612_p4), %s647_s18, 256, %s645_s23, %s294_s15  }
  0xab PF: > { %p410_p2 = scmp.ge.s32.totalorder %s545_s17, 2  ;;  %s322_s9 = sand.u32 1, %s525_s12  }
  0xac   : > { %s323_s10 = scalar_lea.sflag [#allocation3], %s322_s9 }
  0xad   : > { %p407_p3 = pnand %p410_p2, %p619_p8 }
  0xaf   : > { %520 = dma.done.wait (!%p407_p3), %s323_s10, 256  }
  0xb0   : > { %522 = vsyncadd (!%p407_p3), %s323_s10, 4294967040  ;;  %s16_s17 = sadd.s32 1, %s545_s17   ;;  %s700_s12 = smov %s529_s13 }
  0xb1   : > { %p13_p5 = scmp.ge.s32.totalorder %s16_s17, 4   ;;  %s701_s13 = smov %s533_s14 }
  0xb2   : > { %s702_s14 = smov %s625_s25  ;;  %s703_s15 = smov %s541_s16 }
  0xb3   : > { %s704_s16 = smov %s706_s20  ;;  %15 = sbr.rel (!%p13_p5) target bundleno = 4 (0x4), region = 70 }
  0xba   :  { %328 = vsyncpa [#allocation3], 1 }
  0xbb   :  { %330 = vsyncpa [#allocation3 + $0x1], 1 }

</bundles_post_ra>
